<compile_context>
chip_gen: v7x
topology: tpu7x:2x2x1
jax: 0.10.0
libtpu: 0.0.40
codegen_flags: <defaults>
</compile_context>

<pallas_src>
import jax
import jax.numpy as jnp
from jax.experimental import pallas as pl
from jax.experimental.pallas import tpu as pltpu

BN_EPS = 1e-5


def _round_up(x, m):
    return ((x + m - 1) // m) * m


# ---------------------------------------------------------------------------
# fused kernel
# ---------------------------------------------------------------------------
def _pyramid_kernel(x_ref, at_ref, wt_ref, shift_ref, bounds_ref, bt_ref,
                    o_ref, pooled_ref, z_ref):
    """Grid = (N, phase, hw_tile); everything is channels-major (NCHW-style).

    phase 0             : pooledT(C,S)  += x_tile(C,t_hw) @ A_T_tile(t_hw,S)
    phase 0, last tile  : zT(PC,S) = relu(W_T @ pooledT + shift) * path-mask
    phase 1, every tile : out_tile[:C] = x_tile            (identity concat)
                          out_tile[C:] = zT @ B_T_tile     (bilinear upsample)
    """
    ph = pl.program_id(1)
    t = pl.program_id(2)
    n_t = pl.num_programs(2)
    c_in = x_ref.shape[0]

    @pl.when(jnp.logical_and(ph == 0, t == 0))
    def _():
        pooled_ref[...] = jnp.zeros_like(pooled_ref)

    @pl.when(ph == 0)
    def _():
        # stacked average pooling for every path at once (bf16 MXU, f32 acc)
        pooled_ref[...] += jnp.dot(x_ref[...].astype(jnp.bfloat16), at_ref[...],
                                   preferred_element_type=jnp.float32)

    @pl.when(jnp.logical_and(ph == 0, t == n_t - 1))
    def _():
        # 1x1 conv (BN scale pre-folded into W_T) + BN shift + ReLU, once per
        # batch on the stacked pooled block; done at the tail of phase 0 so it
        # overlaps the prefetch of the first phase-1 B/x/out tiles.
        z = jnp.dot(wt_ref[...], pooled_ref[...].astype(jnp.bfloat16),
                    preferred_element_type=jnp.float32)
        z = jnp.maximum(z + shift_ref[...], 0.0)
        # block-diagonal path mask generated in-register (kills cross-path and
        # padded-position garbage) instead of DMA'ing a (PC, S) mask tensor.
        s_idx = jax.lax.broadcasted_iota(jnp.int32, z.shape, 1)
        valid = jnp.logical_and(s_idx >= bounds_ref[:, 0:1],
                                s_idx < bounds_ref[:, 1:2])
        z_ref[...] = jnp.where(valid, z, 0.0).astype(z_ref.dtype)

    @pl.when(ph == 1)
    def _():
        # identity (torch.cat) channels: exact f32 copy of x
        o_ref[0:c_in, :] = x_ref[...]
        # bilinear upsample of every path at once, lane-dense along spatial
        o_ref[c_in:, :] = jnp.dot(z_ref[...], bt_ref[...],
                                  preferred_element_type=jnp.float32)


# ---------------------------------------------------------------------------
# operand construction (host-side, plain JAX)
# ---------------------------------------------------------------------------
def _avg_pool_matrix(out_pos, in_size, k):
    """Rows = pooled positions; row r averages input columns [r*k, r*k+k)."""
    rows = jnp.repeat(jnp.arange(out_pos), k)
    cols = (jnp.arange(out_pos)[:, None] * k + jnp.arange(k)[None, :]).reshape(-1)
    m = jnp.zeros((out_pos, in_size), jnp.float32)
    return m.at[rows, cols].set(1.0 / k)


def _interp_matrix(out_size, in_size, align_corners=False):
    """1D bilinear interpolation matrix (out_size, in_size)."""
    # TODO(synk): old-PyTorch F.upsample(mode='bilinear') defaulted to
    # align_corners=True; modern default is False. Flag selects either.
    i = jnp.arange(out_size, dtype=jnp.float32)
    if align_corners:
        if out_size == 1 or in_size == 1:
            src = jnp.zeros_like(i)
        else:
            src = i * ((in_size - 1) / (out_size - 1))
    else:
        src = (i + 0.5) * (in_size / out_size) - 0.5
        src = jnp.maximum(src, 0.0)
    i0 = jnp.minimum(jnp.floor(src).astype(jnp.int32), in_size - 1)
    i1 = jnp.minimum(i0 + 1, in_size - 1)
    w1 = src - i0.astype(jnp.float32)
    w0 = 1.0 - w1
    rows = jnp.arange(out_size)
    m = jnp.zeros((out_size, in_size), jnp.float32)
    m = m.at[rows, i0].add(w0)
    m = m.at[rows, i1].add(w1)
    return m


def _build_fused_operands(conv_weights, bn_params, pool_sizes, H, W, hw_pad,
                          align_corners=False):
    """Stack every path into one transposed pooling matrix A_T (HW_pad, S_pad),
    one BN-scale-folded transposed conv weight W_T (PC, C), one shift (PC, 1),
    one per-output-channel pooled-position range (PC, 2) and one transposed
    upsample matrix B_T (S_pad, HW_pad). A/B/W are bf16 (native MXU dtype)."""
    num_paths = len(pool_sizes)
    C, Cout = conv_weights[0].shape
    PC = num_paths * Cout
    HW = H * W

    a_blocks, b_blocks, offs, pps = [], [], [], []
    off = 0
    for p in pool_sizes:
        # PyTorch: kernel = stride = floor(dim / p), no padding (trailing rows drop)
        kh, kw = H // p, W // p
        oh, ow = (H - kh) // kh + 1, (W - kw) // kw + 1
        a_blocks.append(jnp.kron(_avg_pool_matrix(oh, H, kh),
                                 _avg_pool_matrix(ow, W, kw)))           # (oh*ow, HW)
        b_blocks.append(jnp.kron(_interp_matrix(H, oh, align_corners),
                                 _interp_matrix(W, ow, align_corners)))  # (HW, oh*ow)
        offs.append(off)
        pps.append(oh * ow)
        off += oh * ow

    S = off
    s_pad = _round_up(max(S, 8), 128)   # lane-dense pooled / z blocks

    a_t = jnp.zeros((hw_pad, s_pad), jnp.float32)   # padded rows/cols stay zero
    b_t = jnp.zeros((s_pad, hw_pad), jnp.float32)
    w_t = jnp.zeros((PC, C), jnp.float32)
    shift = jnp.zeros((PC, 1), jnp.float32)
    bounds = jnp.zeros((PC, 2), jnp.int32)

    for i in range(num_paths):
        o, pp = offs[i], pps[i]
        gamma, beta, mean, var = bn_params[i]
        scale = gamma / jnp.sqrt(var + BN_EPS)
        a_t = a_t.at[:HW, o:o + pp].set(a_blocks[i].T)
        b_t = b_t.at[o:o + pp, :HW].set(b_blocks[i].T)
        # fold BN scale into the conv weight; only the shift remains as a bias
        w_t = w_t.at[i * Cout:(i + 1) * Cout, :].set(
            (conv_weights[i] * scale[None, :]).T)
        shift = shift.at[i * Cout:(i + 1) * Cout, 0].set(beta - mean * scale)
        bounds = bounds.at[i * Cout:(i + 1) * Cout, 0].set(o)
        bounds = bounds.at[i * Cout:(i + 1) * Cout, 1].set(o + pp)

    # TODO(synk): 1/k pooling weights for non-power-of-two kernels pick up a
    # small extra bf16 rounding (exact for the power-of-two kernels used here).
    return (a_t.astype(jnp.bfloat16), w_t.astype(jnp.bfloat16), shift, bounds,
            b_t.astype(jnp.bfloat16))


# ---------------------------------------------------------------------------
# per-generation sizing / spec helpers
# ---------------------------------------------------------------------------
def _device_defaults():
    """(vmem_limit_bytes, max_tile_hw) per TPU generation:
    v7x has only 64 MiB VMEM per TensorCore; v5e/v6e have 128 MiB physical."""
    try:
        cap = pltpu.get_tpu_info().vmem_capacity_bytes
    except Exception:                       # detection failed -> conservative
        return 32 * 1024 * 1024, 512
    if cap <= 64 * 1024 * 1024:
        return 48 * 1024 * 1024, 512        # v7x-class
    return 96 * 1024 * 1024, 1024           # v5e / v6e


def _const_spec(shape):
    """Grid-invariant operand: constant index map + single-buffered VMEM."""
    index_map = lambda n, ph, t: (0,) * len(shape)
    try:
        return pl.BlockSpec(shape, index_map, pipeline_mode=pl.Buffered(1))
    except Exception:                       # fallback if Buffered(1) unsupported
        return pl.BlockSpec(shape, index_map)


# ---------------------------------------------------------------------------
# forward pass
# ---------------------------------------------------------------------------
def pyramid_pooling_forward(x, conv_weights, bn_params, pool_sizes,
                            align_corners=False, max_tile_hw=None,
                            vmem_limit_bytes=None):
    """x: (N, C, H, W) float32 (NCHW, as in PyTorch).
    Returns the NCHW concatenation [x, path_0, ..., path_{k-1}]."""
    N, C, H, W = x.shape
    HW = H * W
    num_paths = len(pool_sizes)
    Cout = conv_weights[0].shape[1]
    PC = num_paths * Cout

    dflt_vmem, dflt_tile = _device_defaults()
    vmem_limit_bytes = dflt_vmem if vmem_limit_bytes is None else vmem_limit_bytes
    max_tile_hw = dflt_tile if max_tile_hw is None else max_tile_hw

    # spatial tiling: pad HW to a multiple of the (128-aligned) tile so the
    # 2-phase pipeline always engages (no full-HW fallback on odd map sizes).
    t_hw = max(128, (min(max_tile_hw, _round_up(HW, 128)) // 128) * 128)
    hw_pad = _round_up(HW, t_hw)
    n_t = hw_pad // t_hw

    a_t, w_t, shift, bounds, b_t = _build_fused_operands(
        conv_weights, bn_params, pool_sizes, H, W, hw_pad, align_corners)
    s_pad = a_t.shape[1]

    x_flat = x.reshape(N, C, HW)            # free reshape, x stays NCHW in HBM
    if hw_pad != HW:
        x_flat = jnp.pad(x_flat, ((0, 0), (0, 0), (0, hw_pad - HW)))

    def x_map(n, ph, t):                    # read in phase 0 (pool) & 1 (identity)
        return (n, 0, t)

    def a_map(n, ph, t):                    # walks tiles in phase 0 only
        return (jnp.where(ph == 0, t, n_t - 1), 0)

    def b_map(n, ph, t):                    # walks tiles in phase 1 only
        return (0, jnp.where(ph == 1, t, 0))

    def o_map(n, ph, t):                    # written in phase 1 only
        return (n, 0, jnp.where(ph == 1, t, 0))

    out = pl.pallas_call(
        _pyramid_kernel,
        out_shape=jax.ShapeDtypeStruct((N, C + PC, hw_pad), jnp.float32),
        grid=(N, 2, n_t),
        in_specs=[
            pl.BlockSpec((None, C, t_hw), x_map),    # x, NCHW f32 (read once/phase)
            pl.BlockSpec((t_hw, s_pad), a_map),      # stacked pooling matrix^T bf16
            _const_spec((PC, C)),                    # BN-folded conv weight^T bf16
            _const_spec((PC, 1)),                    # BN shift
            _const_spec((PC, 2)),                    # per-channel path bounds (i32)
            pl.BlockSpec((s_pad, t_hw), b_map),      # stacked upsample matrix^T bf16
        ],
        out_specs=pl.BlockSpec((None, C + PC, t_hw), o_map),
        scratch_shapes=[
            pltpu.VMEM((C, s_pad), jnp.float32),     # pooled accumulator
            pltpu.VMEM((PC, s_pad), jnp.bfloat16),   # post conv+BN+ReLU block
        ],
        compiler_params=pltpu.CompilerParams(
            dimension_semantics=("parallel", "arbitrary", "arbitrary"),
            vmem_limit_bytes=vmem_limit_bytes,
        ),
    )(x_flat, a_t, w_t, shift, bounds, b_t)

    # TODO(synk): for N == 1 on v7x a second 'parallel' grid axis splitting the
    # PC output channels would keep both TensorCores busy; not implemented.
    if hw_pad != HW:
        out = out[:, :, :HW]
    return out.reshape(N, C + PC, H, W)


# ---------------------------------------------------------------------------
# plain-JAX f32 reference mirroring the PyTorch module (fusion_mode='cat')
# ---------------------------------------------------------------------------
def _reference_forward(x, conv_weights, bn_params, pool_sizes, align_corners=False):
    N, C, H, W = x.shape
    hi = jax.lax.Precision.HIGHEST
    outs = [x]
    for i, p in enumerate(pool_sizes):
        kh, kw = H // p, W // p
        oh, ow = (H - kh) // kh + 1, (W - kw) // kw + 1
        pooled = x[:, :, :oh * kh, :ow * kw].reshape(N, C, oh, kh, ow, kw)
        pooled = pooled.mean(axis=(3, 5))
        y = jnp.einsum("nchw,ck->nkhw", pooled, conv_weights[i], precision=hi)
        gamma, beta, mean, var = bn_params[i]
        y = (y - mean[None, :, None, None]) * (
            gamma[None, :, None, None] /
            jnp.sqrt(var[None, :, None, None] + BN_EPS)) + beta[None, :, None, None]
        y = jnp.maximum(y, 0.0)
        mh = _interp_matrix(H, oh, align_corners)
        mw = _interp_matrix(W, ow, align_corners)
        outs.append(jnp.einsum("Hh,nkhw,Ww->nkHW", mh, y, mw, precision=hi))
    return jnp.concatenate(outs, axis=1)


if __name__ == "__main__":
    key = jax.random.PRNGKey(0)
    N, C, H, W = 2, 8, 16, 16
    pool_sizes = [1, 2, 4, 8]
    num_paths = len(pool_sizes)
    Cout = C // num_paths  # = int(in_channels / len(pool_sizes)), as in PyTorch

    k_x, *k_params = jax.random.split(key, 1 + 3 * num_paths)
    x = jax.random.normal(k_x, (N, C, H, W), jnp.float32)

    conv_weights, bn_params = [], []
    for i in range(num_paths):
        kw_, kg, kb = k_params[3 * i], k_params[3 * i + 1], k_params[3 * i + 2]
        # PyTorch conv weight is (Cout, C, 1, 1); we store its (C, Cout) transpose.
        conv_weights.append(0.1 * jax.random.normal(kw_, (C, Cout), jnp.float32))
        gamma = 1.0 + 0.1 * jax.random.normal(kg, (Cout,), jnp.float32)
        beta = 0.1 * jax.random.normal(kb, (Cout,), jnp.float32)
        mean = jnp.zeros((Cout,), jnp.float32)
        var = jnp.ones((Cout,), jnp.float32)
        # TODO(synk): BatchNorm is folded in inference mode (running stats);
        # training-mode batch statistics are not reproduced.
        bn_params.append((gamma, beta, mean, var))

    # max_tile_hw=128 -> HW=256 runs as 2 spatial tiles, exercising the tiled
    # pooling reduction (phase 0) and the tiled upsample/store (phase 1).
    out = pyramid_pooling_forward(x, conv_weights, bn_params, pool_sizes,
                                  max_tile_hw=128)
    out = jax.block_until_ready(out)
    assert out.shape == (N, C + num_paths * Cout, H, W)

    # identity channels must be exact f32 copies of x (torch.cat semantics)
    assert jnp.array_equal(out[:, :C], x)

    # pyramid-path channels vs a plain-JAX f32 reference of the PyTorch module
    # (kernel uses bf16 operands on the MXU -> tolerance covers that rounding)
    ref = _reference_forward(x, conv_weights, bn_params, pool_sizes)
    err = float(jnp.max(jnp.abs(out[:, C:] - ref[:, C:])))
    assert err < 2e-2, f"max abs err {err}"

    print("KERNEL_OK")
</pallas_src>

<mosaic_0001>
module attributes {stable_mosaic.version = 11 : i64} {
  func.func @_pyramid_kernel(%arg0: i32, %arg1: i32, %arg2: i32, %arg3: memref<1x8x128xf32, #tpu.memory_space<vmem>>, %arg4: memref<128x128xbf16, #tpu.memory_space<vmem>>, %arg5: memref<8x8xbf16, #tpu.memory_space<vmem>>, %arg6: memref<8x1xf32, #tpu.memory_space<vmem>>, %arg7: memref<8x2xi32, #tpu.memory_space<vmem>>, %arg8: memref<128x128xbf16, #tpu.memory_space<vmem>>, %arg9: memref<1x16x128xf32, #tpu.memory_space<vmem>>, %arg10: memref<8x128xf32, #tpu.memory_space<vmem>>, %arg11: memref<8x128xbf16, #tpu.memory_space<vmem>>) attributes {dimension_semantics = [#tpu.dimension_semantics<parallel>, #tpu.dimension_semantics<arbitrary>, #tpu.dimension_semantics<arbitrary>], iteration_bounds = array<i64: 2, 2, 2>, scalar_prefetch = 0 : i64, scratch_operands = 2 : i64, tpu.core_type = #tpu.core_type<tc>, window_params = [{transform_indices = @transform_0, window_bounds = array<i64: 1, 8, 128>}, {transform_indices = @transform_1, window_bounds = array<i64: 128, 128>}, {pipeline_mode = #tpu.pipeline_mode<synchronous>, transform_indices = @transform_2, window_bounds = array<i64: 8, 8>}, {pipeline_mode = #tpu.pipeline_mode<synchronous>, transform_indices = @transform_3, window_bounds = array<i64: 8, 1>}, {pipeline_mode = #tpu.pipeline_mode<synchronous>, transform_indices = @transform_4, window_bounds = array<i64: 8, 2>}, {transform_indices = @transform_5, window_bounds = array<i64: 128, 128>}, {transform_indices = @transform_6, window_bounds = array<i64: 1, 16, 128>}]} {
    %c0_i32 = arith.constant 0 : i32
    %0 = arith.cmpi eq, %arg1, %c0_i32 : i32
    %c0_i32_0 = arith.constant 0 : i32
    %1 = arith.cmpi eq, %arg2, %c0_i32_0 : i32
    %2 = arith.andi %0, %1 : i1
    %3 = arith.extui %2 : i1 to i32
    %c0_i32_1 = arith.constant 0 : i32
    %4 = arith.cmpi ne, %3, %c0_i32_1 : i32
    scf.if %4 {
      %cst = arith.constant 0.000000e+00 : f32
      %16 = vector.broadcast %cst : f32 to vector<8x128xf32>
      %c0 = arith.constant 0 : index
      %c0_8 = arith.constant 0 : index
      %17 = vector.load %arg10[%c0, %c0_8] : memref<8x128xf32, #tpu.memory_space<vmem>>, vector<8x128xf32>
      tpu.vector_store %arg10[%c0, %c0_8], %16 {strides = array<i32>} : memref<8x128xf32, #tpu.memory_space<vmem>>, vector<8x128xf32>,
    } else {
    }
    %c0_i32_2 = arith.constant 0 : i32
    %5 = arith.cmpi eq, %arg1, %c0_i32_2 : i32
    %6 = arith.extui %5 : i1 to i32
    %c0_i32_3 = arith.constant 0 : i32
    %7 = arith.cmpi ne, %6, %c0_i32_3 : i32
    scf.if %7 {
      %c0 = arith.constant 0 : index
      %c0_8 = arith.constant 0 : index
      %16 = vector.load %arg10[%c0, %c0_8] : memref<8x128xf32, #tpu.memory_space<vmem>>, vector<8x128xf32>
      %c0_9 = arith.constant 0 : index
      %c0_10 = arith.constant 0 : index
      %c0_11 = arith.constant 0 : index
      %17 = vector.load %arg3[%c0_9, %c0_10, %c0_11] : memref<1x8x128xf32, #tpu.memory_space<vmem>>, vector<1x8x128xf32>
      %18 = vector.shape_cast %17 : vector<1x8x128xf32> to vector<8x128xf32>
      %19 = arith.truncf %18 : vector<8x128xf32> to vector<8x128xbf16>
      %c0_12 = arith.constant 0 : index
      %c0_13 = arith.constant 0 : index
      %20 = vector.load %arg4[%c0_12, %c0_13] : memref<128x128xbf16, #tpu.memory_space<vmem>>, vector<128x128xbf16>
      %cst = arith.constant dense<0.000000e+00> : vector<8x128xf32>
      %21 = tpu.matmul %19, %20, %cst {dimension_numbers = #tpu.dot_dimension_numbers<[1], [0], [0], [1], [0, 0, 1, 1], [], []>} : vector<8x128xbf16>, vector<128x128xbf16>, vector<8x128xf32> -> vector<8x128xf32>
      %22 = arith.addf %16, %21 : vector<8x128xf32>
      %c0_14 = arith.constant 0 : index
      %c0_15 = arith.constant 0 : index
      %23 = vector.load %arg10[%c0_14, %c0_15] : memref<8x128xf32, #tpu.memory_space<vmem>>, vector<8x128xf32>
      tpu.vector_store %arg10[%c0_14, %c0_15], %22 {strides = array<i32>} : memref<8x128xf32, #tpu.memory_space<vmem>>, vector<8x128xf32>,
    } else {
    }
    %c0_i32_4 = arith.constant 0 : i32
    %8 = arith.cmpi eq, %arg1, %c0_i32_4 : i32
    %c1_i32 = arith.constant 1 : i32
    %9 = arith.cmpi eq, %arg2, %c1_i32 : i32
    %10 = arith.andi %8, %9 : i1
    %11 = arith.extui %10 : i1 to i32
    %c0_i32_5 = arith.constant 0 : i32
    %12 = arith.cmpi ne, %11, %c0_i32_5 : i32
    scf.if %12 {
      %c0 = arith.constant 0 : index
      %c0_8 = arith.constant 0 : index
      %16 = vector.load %arg5[%c0, %c0_8] : memref<8x8xbf16, #tpu.memory_space<vmem>>, vector<8x8xbf16>
      %c0_9 = arith.constant 0 : index
      %c0_10 = arith.constant 0 : index
      %17 = vector.load %arg10[%c0_9, %c0_10] : memref<8x128xf32, #tpu.memory_space<vmem>>, vector<8x128xf32>
      %18 = arith.truncf %17 : vector<8x128xf32> to vector<8x128xbf16>
      %cst = arith.constant dense<0.000000e+00> : vector<8x128xf32>
      %19 = tpu.matmul %16, %18, %cst {dimension_numbers = #tpu.dot_dimension_numbers<[1], [0], [0], [1], [0, 0, 1, 1], [], []>} : vector<8x8xbf16>, vector<8x128xbf16>, vector<8x128xf32> -> vector<8x128xf32>
      %c0_11 = arith.constant 0 : index
      %c0_12 = arith.constant 0 : index
      %20 = vector.load %arg6[%c0_11, %c0_12] : memref<8x1xf32, #tpu.memory_space<vmem>>, vector<8x1xf32>
      %21 = vector.broadcast %20 : vector<8x1xf32> to vector<8x128xf32>
      %22 = arith.addf %19, %21 : vector<8x128xf32>
      %cst_13 = arith.constant 0.000000e+00 : f32
      %23 = vector.broadcast %cst_13 : f32 to vector<8x128xf32>
      %24 = arith.maximumf %22, %23 : vector<8x128xf32>
      %25 = tpu.iota {dimensions = array<i32: 1>} : vector<8x128xi32>
      %c0_14 = arith.constant 0 : index
      %c0_15 = arith.constant 0 : index
      %26 = vector.load %arg7[%c0_14, %c0_15] : memref<8x2xi32, #tpu.memory_space<vmem>>, vector<8x1xi32>
      %27 = vector.broadcast %26 : vector<8x1xi32> to vector<8x128xi32>
      %28 = arith.cmpi sge, %25, %27 : vector<8x128xi32>
      %c0_16 = arith.constant 0 : index
      %c1 = arith.constant 1 : index
      %29 = vector.load %arg7[%c0_16, %c1] : memref<8x2xi32, #tpu.memory_space<vmem>>, vector<8x1xi32>
      %30 = vector.broadcast %29 : vector<8x1xi32> to vector<8x128xi32>
      %31 = arith.cmpi slt, %25, %30 : vector<8x128xi32>
      %32 = arith.andi %28, %31 : vector<8x128xi1>
      %cst_17 = arith.constant 0.000000e+00 : f32
      %33 = vector.broadcast %cst_17 : f32 to vector<8x128xf32>
      %34 = arith.select %32, %24, %33 : vector<8x128xi1>, vector<8x128xf32>
      %35 = arith.truncf %34 : vector<8x128xf32> to vector<8x128xbf16>
      %c0_18 = arith.constant 0 : index
      %c0_19 = arith.constant 0 : index
      %36 = vector.load %arg11[%c0_18, %c0_19] : memref<8x128xbf16, #tpu.memory_space<vmem>>, vector<8x128xbf16>
      tpu.vector_store %arg11[%c0_18, %c0_19], %35 {strides = array<i32>} : memref<8x128xbf16, #tpu.memory_space<vmem>>, vector<8x128xbf16>,
    } else {
    }
    %c1_i32_6 = arith.constant 1 : i32
    %13 = arith.cmpi eq, %arg1, %c1_i32_6 : i32
    %14 = arith.extui %13 : i1 to i32
    %c0_i32_7 = arith.constant 0 : i32
    %15 = arith.cmpi ne, %14, %c0_i32_7 : i32
    scf.if %15 {
      %c0 = arith.constant 0 : index
      %c0_8 = arith.constant 0 : index
      %c0_9 = arith.constant 0 : index
      %16 = vector.load %arg3[%c0, %c0_8, %c0_9] : memref<1x8x128xf32, #tpu.memory_space<vmem>>, vector<1x8x128xf32>
      %17 = vector.shape_cast %16 : vector<1x8x128xf32> to vector<8x128xf32>
      %c0_10 = arith.constant 0 : index
      %c0_11 = arith.constant 0 : index
      %c0_12 = arith.constant 0 : index
      %18 = vector.load %arg9[%c0_10, %c0_11, %c0_12] : memref<1x16x128xf32, #tpu.memory_space<vmem>>, vector<1x8x128xf32>
      %19 = vector.shape_cast %18 : vector<1x8x128xf32> to vector<8x128xf32>
      %20 = vector.shape_cast %17 : vector<8x128xf32> to vector<1x8x128xf32>
      tpu.vector_store %arg9[%c0_10, %c0_11, %c0_12], %20 {strides = array<i32>} : memref<1x16x128xf32, #tpu.memory_space<vmem>>, vector<1x8x128xf32>,
      %c0_13 = arith.constant 0 : index
      %c0_14 = arith.constant 0 : index
      %21 = vector.load %arg11[%c0_13, %c0_14] : memref<8x128xbf16, #tpu.memory_space<vmem>>, vector<8x128xbf16>
      %c0_15 = arith.constant 0 : index
      %c0_16 = arith.constant 0 : index
      %22 = vector.load %arg8[%c0_15, %c0_16] : memref<128x128xbf16, #tpu.memory_space<vmem>>, vector<128x128xbf16>
      %cst = arith.constant dense<0.000000e+00> : vector<8x128xf32>
      %23 = tpu.matmul %21, %22, %cst {dimension_numbers = #tpu.dot_dimension_numbers<[1], [0], [0], [1], [0, 0, 1, 1], [], []>} : vector<8x128xbf16>, vector<128x128xbf16>, vector<8x128xf32> -> vector<8x128xf32>
      %c0_17 = arith.constant 0 : index
      %c8 = arith.constant 8 : index
      %c0_18 = arith.constant 0 : index
      %24 = vector.load %arg9[%c0_17, %c8, %c0_18] : memref<1x16x128xf32, #tpu.memory_space<vmem>>, vector<1x8x128xf32>
      %25 = vector.shape_cast %24 : vector<1x8x128xf32> to vector<8x128xf32>
      %26 = vector.shape_cast %23 : vector<8x128xf32> to vector<1x8x128xf32>
      tpu.vector_store %arg9[%c0_17, %c8, %c0_18], %26 {strides = array<i32>} : memref<1x16x128xf32, #tpu.memory_space<vmem>>, vector<1x8x128xf32>,
    } else {
    }
    return
  }
  func.func @transform_0(%arg0: i32, %arg1: i32, %arg2: i32) -> (i32, i32, i32) {
    %c0_i32 = arith.constant 0 : i32
    %c0_i32_0 = arith.constant 0 : i32
    return %arg0, %c0_i32, %arg2 : i32, i32, i32
  }
  func.func @transform_1(%arg0: i32, %arg1: i32, %arg2: i32) -> (i32, i32) {
    %c0_i32 = arith.constant 0 : i32
    %0 = arith.cmpi eq, %arg1, %c0_i32 : i32
    %c1_i32 = arith.constant 1 : i32
    %1 = arith.select %0, %arg2, %c1_i32 : i32
    %c0_i32_0 = arith.constant 0 : i32
    %c0_i32_1 = arith.constant 0 : i32
    return %1, %c0_i32_0 : i32, i32
  }
  func.func @transform_2(%arg0: i32, %arg1: i32, %arg2: i32) -> (i32, i32) {
    %c0_i32 = arith.constant 0 : i32
    %c0_i32_0 = arith.constant 0 : i32
    %c0_i32_1 = arith.constant 0 : i32
    return %c0_i32, %c0_i32_0 : i32, i32
  }
  func.func @transform_3(%arg0: i32, %arg1: i32, %arg2: i32) -> (i32, i32) {
    %c0_i32 = arith.constant 0 : i32
    %c0_i32_0 = arith.constant 0 : i32
    %c0_i32_1 = arith.constant 0 : i32
    return %c0_i32, %c0_i32_0 : i32, i32
  }
  func.func @transform_4(%arg0: i32, %arg1: i32, %arg2: i32) -> (i32, i32) {
    %c0_i32 = arith.constant 0 : i32
    %c0_i32_0 = arith.constant 0 : i32
    %c0_i32_1 = arith.constant 0 : i32
    return %c0_i32, %c0_i32_0 : i32, i32
  }
  func.func @transform_5(%arg0: i32, %arg1: i32, %arg2: i32) -> (i32, i32) {
    %c1_i32 = arith.constant 1 : i32
    %0 = arith.cmpi eq, %arg1, %c1_i32 : i32
    %c0_i32 = arith.constant 0 : i32
    %1 = arith.select %0, %arg2, %c0_i32 : i32
    %c0_i32_0 = arith.constant 0 : i32
    %c0_i32_1 = arith.constant 0 : i32
    return %c0_i32_0, %1 : i32, i32
  }
  func.func @transform_6(%arg0: i32, %arg1: i32, %arg2: i32) -> (i32, i32, i32) {
    %c1_i32 = arith.constant 1 : i32
    %0 = arith.cmpi eq, %arg1, %c1_i32 : i32
    %c0_i32 = arith.constant 0 : i32
    %1 = arith.select %0, %arg2, %c0_i32 : i32
    %c0_i32_0 = arith.constant 0 : i32
    %c0_i32_1 = arith.constant 0 : i32
    return %arg0, %c0_i32_0, %1 : i32, i32, i32
  }
}

</mosaic_0001>

<bundles_post_ra>
// kernel: tpu_custom_call.1
= control target key start
LH: loop header
LB: loop body
LE: loop exit
PB: predicated region body
PF: predicated region fallthrough
CT: control target
= control target key end

     0   :  { %s2050_s0 = inlined_call_operand.hbm [shape: f32[2,8,256], index: 0, kind: input, shape index: {}]   ;;  %s2051_s1 = inlined_call_operand.hbm [shape: bf16[256,128], index: 1, kind: input, shape index: {}]   ;;  %s2052_s2 = inlined_call_operand.vmem [shape: bf16[8,8], index: 2, kind: input, shape index: {}]   ;;  %s2053_s3 = inlined_call_operand.vmem [shape: f32[8,1], index: 3, kind: input, shape index: {}]   ;;  %s2054_s4 = inlined_call_operand.vmem [shape: s32[8,2], index: 4, kind: input, shape index: {}]   ;;  %s2055_s5 = inlined_call_operand.hbm [shape: bf16[128,256], index: 5, kind: input, shape index: {}]   ;;  %s2056_s6 = inlined_call_operand.hbm [shape: f32[2,16,256], index: 6, kind: output, shape index: {}]  }
   0x1   :  { %2080 = sst [smem:[#allocation32_spill]] %s2050_s0 }
   0x2   :  { %2081 = sst [smem:[#allocation33_spill]] %s2051_s1 }
   0x3   :  { %2082 = sst [smem:[#allocation34_spill]] %s2052_s2 }
   0x4   :  { %2083 = sst [smem:[#allocation35_spill]] %s2053_s3 }
   0x5   :  { %2084 = sst [smem:[#allocation36_spill]] %s2054_s4 }
   0x6   :  { %2085 = sst [smem:[#allocation37_spill]] %s2055_s5 }
   0x7   :  { %2086 = sst [smem:[#allocation38_spill]] %s2056_s6 }
   0x8   :  { %11 = vsyncpa [#allocation5], 0 }
   0x9   :  { %13 = vsyncpa [#allocation5 + $0x1], 0 }
   0xa   :  { %14 = vsyncpa [#allocation8], 0 }
   0xb   :  { %16 = vsyncpa [#allocation8 + $0x1], 0 }
   0xc   :  { %17 = vsyncpa [#allocation6], 0 }
   0xd   :  { %19 = vsyncpa [#allocation6 + $0x1], 0  ;;  %s1513_s21 = smov 0   ;;  %s1515_s22 = smov 0  }
   0xe   :  { %s1517_s23 = smov 0   ;;  %s1519_s24 = smov 0  }
   0xf   :  { %s1521_s25 = smov 0   ;;  %s1523_s26 = smov 0  }
  0x10   :  { %s1525_s27 = smov 0   ;;  %s1527_s28 = smov 0  }
  0x11   :  { %s1529_s29 = smov 0   ;;  %s1531_s30 = smov 0  }
  0x12   :  { %s1533_s7 = smov 0   ;;  %s1535_s8 = smov 0  }
  0x13   :  { %s1537_s9 = smov 0   ;;  %s1539_s10 = smov 0  }
  0x14   :  { %s1541_s11 = smov 0   ;;  %s1543_s12 = smov 0  }
  0x15   :  { %s1545_s13 = smov 0   ;;  %s1547_s14 = smov 0  }
  0x16   :  { %s1549_s15 = smov 0  }
  0x17 LB: > { %2087 = sst [smem:[#allocation15_spill]] %s1385_s21  ;;  %s37_s16 = sadd.s32 1, %s1445_s12  ;;  %s1457_s15 = sphi %s1549_s15, %s25_s15   ;;  %s1453_s14 = sphi %s1547_s14, %s2187_s14   ;;  %s1449_s13 = sphi %s1545_s13, %s2186_s13   ;;  %s1445_s12 = sphi %s1543_s12, %s2185_s12   ;;  %s1441_s11 = sphi %s1541_s11, %s2184_s11   ;;  %s1437_s10 = sphi %s1539_s10, %s2183_s10   ;;  %s1433_s9 = sphi %s1537_s9, %s2182_s9   ;;  %s1429_s8 = sphi %s1535_s8, %s2181_s8   ;;  %s1425_s7 = sphi %s1533_s7, %s2180_s7   ;;  %s1421_s30 = sphi %s1531_s30, %s2179_s30   ;;  %s1417_s29 = sphi %s1529_s29, %s2178_s29   ;;  %s1413_s28 = sphi %s1527_s28, %s2177_s28   ;;  %s1409_s27 = sphi %s1525_s27, %s2176_s27   ;;  %s1405_s26 = sphi %s1523_s26, %s2175_s26   ;;  %s1401_s25 = sphi %s1521_s25, %s2174_s25   ;;  %s1397_s24 = sphi %s1519_s24, %s2173_s24   ;;  %s1393_s23 = sphi %s1517_s23, %s2172_s23   ;;  %s1389_s22 = sphi %s1515_s22, %s2170_s22   ;;  %s1385_s21 = sphi %s1513_s21, %s2159_s21  }
  0x18   : > { %2088 = sst [smem:[#allocation16_spill]] %s1389_s22  ;;  %s40_s17 = sadd.s32 1, %s1449_s13 }
  0x19   : > { %2089 = sst [smem:[#allocation17_spill]] %s1393_s23  ;;  %p38_p0 = scmp.ge.s32.totalorder %s37_s16, 2 }
  0x1a   : > { %2090 = sst [smem:[#allocation18_spill]] %s1397_s24  ;;  %p2065_p1 = scmp.eq.s32.totalorder %s1457_s15, 0 }
  0x1b   : > { %2091 = sst [smem:[#allocation19_spill]] %s1417_s29  ;;  %p76_p2 = scmp.eq.s32.totalorder %s1449_s13, 0 }
  0x1c   : > { %2092 = sst [smem:[#allocation20_spill]] %s1429_s8  ;;  %s83_s18 = sadd.s32 1, %s1417_s29 }
  0x1d   : > { %2093 = sst [smem:[#allocation21_spill]] %s1433_s9  ;;  %s2189_s16 = smov (%p38_p0, %s37_s16), 0 }
  0x1e   : > { %2094 = sst [smem:[#allocation22_spill]] %s1437_s10  ;;  %s2191_s17 = smov (!%p38_p0, %s40_s17), %s1449_s13 }
  0x1f   : > { %2095 = sst [smem:[#allocation23_spill]] %s1441_s11  ;;  %p42_p3 = scmp.ge.s32.totalorder %s2191_s17, 2 }
  0x20   : > { %2096 = sst [smem:[#allocation24_spill]] %s1449_s13  ;;  %p90_p4 = scmp.ne.s32.totalorder %s1417_s29, %s1413_s28 }
  0x21   : > { %2097 = sst [smem:[#allocation25_spill]] %s2189_s16  ;;  %p2064_p7 = scmp.lt.s32.totalorder %s1457_s15, 8 }
  0x22   : > { %s77_s19 = scalar_select %p76_p2, %s1445_s12, 1 }
  0x23   : > { %s1627_s20 = scalar_select %p42_p3, 0, %s2191_s17  }
  0x24   : > { %p1631_p6 = por %p90_p4, %p2065_p1  ;;  %s274_s11 = sand.u32 1, %s1457_s15  }
  0x25   : > { %2098 = sst [smem:[#allocation26_spill]] %s1627_s20  ;;  %p78_p8 = scmp.eq.s32.totalorder %s1627_s20, 0 }
  0x26   : > { %s276_s2 = sand.u32 1, %s1417_s29   ;;  %s896_s9 = sshll.u32 %s77_s19, 10 }
  0x27   : > { %s79_s4 = scalar_select %p78_p8, %s2189_s16, 1 }
  0x28   : > { %s862_s3 = sshll.u32 %s276_s2, 6  ;;  %s2100_s1 = sld [smem:[#allocation33_spill]] }
  0x29   : > { %s80_s10 = ssub.s32 %s77_s19, %s79_s4  ;;  %s278_s22 = scalar_lea.vmem [#allocation7], %s862_s3 }
  0x2a   : > { %p81_p9 = scmp.eq.s32.totalorder %s80_s10, 0  ;;  %s287_s23 = sshll.u32 %s278_s22, 4  ;;  %s1656_s23 = int_to_ptr.vmem [resolvable:$true] %s287_s23 }
  0x2b   : > { %p1649_p10 = pnand %p2064_p7, %p1631_p6  ;;  %s1658_s0 = scalar_lea.sflag [#allocation8], %s274_s11 }
  0x2c   : > { %s1654_s2 = scalar_select %p81_p9, %s1417_s29, %s83_s18  }
  0x2d   : > { %p1175_p12 = pneg %p1649_p10 }
  0x2e   : > { %s1643_s21 = scalar_lea.hbm %s2100_s1, %s896_s9  ;;  %2102 = sst [smem:[#allocation27_spill]] %s1654_s2 }
  0x2f   : > { %s1173_s4 = scalar_lea.hbm %s1643_s21, 1024  ;;  %s1178_s6 = scalar_lea.hbm %s2100_s1, 2048 }
  0x30   : > { %p1174_p11 = scmp.ne.s32.totalorder %s1643_s21, %s1173_s4  ;;  %p1179_p2 = scmp.lt.u32.totalorder %s1643_s21, %s2100_s1 }
  0x31   : > { %p1180_p4 = scmp.lt.u32.totalorder %s1178_s6, %s1173_s4  ;;  %p1182_p8 = scmp.lt.u32.totalorder %s1173_s4, %s1643_s21 }
  0x32   : > { %p1176_p13 = pnand %p1175_p12, %p1174_p11 }
  0x33   : > { %p1181_p6 = por %p1180_p4, %p1179_p2 }
  0x34   : > { %p1177_p0 = pneg %p1176_p13 }
  0x35   : > { %p1183_p9 = por %p1182_p8, %p1181_p6 }
  0x37   : > { %p1184_p7 = pnand %p1183_p9, %p1177_p0 }
  0x39   : > { %1187 = shalt.err (!%p1184_p7)
}
  0x3a   : > { %s1188_s10 = scalar_lea.vmem %s1656_s23, 1024  ;;  %s1459_s11 = smov [#allocation7]  }
  0x3b   : > { %p1189_p11 = scmp.ne.s32.totalorder %s1656_s23, %s1188_s10  ;;  %s1193_s18 = sshll.u32 %s1459_s11, 4  ;;  %s1194_s18 = int_to_ptr.vmem [resolvable:$false] %s1193_s18 }
  0x3c   : > { %s1195_s19 = scalar_lea.vmem %s1194_s18, 2048  ;;  %p1196_p1 = scmp.lt.s32.totalorder %s1656_s23, %s1194_s18 }
  0x3d   : > { %p1191_p13 = pnand %p1189_p11, %p1175_p12  ;;  %p1197_p2 = scmp.lt.s32.totalorder %s1195_s19, %s1188_s10 }
  0x3f   : > { %p1192_p5 = pneg %p1191_p13  ;;  %p1198_p4 = por %p1197_p2, %p1196_p1 }
  0x41   : > { %p1199_p6 = pnand %p1198_p4, %p1192_p5 }
  0x43   : > { %1202 = shalt.err (!%p1199_p6)
}
  0x44   : > { %s2066_s4 = smov 64   ;;  %s2067_s3 = smov 4  }
  0x45   : > { %977 = dma.hbm_to_vmem [thread:$0]  (!%p1649_p10), %s1643_s21, 1024, %s1656_s23, %s1658_s0, %s2066_s4, %s2066_s4, %s2067_s3  }
  0x46   : > { %p867_p1 = scmp.ge.s32.totalorder %s1457_s15, 1  ;;  %p317_p5 = scmp.lt.s32.totalorder %s1457_s15, 9 }
  0x47   : > { %s1696_s6 = sadd.s32 4294967295, %s1457_s15   ;;  %s44_s22 = sadd.s32 1, %s1453_s14 }
  0x48   : > { %p1691_p7 = pnand %p867_p1, %p317_p5  ;;  %2104 = sst [smem:[#allocation28_spill]] %s1696_s6 }
  0x49   : > { %s2193_s22 = smov (!%p42_p3, %s44_s22), %s1453_s14  ;;  %s49_s21 = ssub.s32 %s1445_s12, %s2189_s16 }
  0x4a   : > { %s2103_s5 = scalar_select %p1691_p7, 1, 0 }
  0x4b   : > { %s53_s23 = sadd.s32 1, %s1429_s8  ;;  %p46_p10 = scmp.ge.s32.totalorder %s2193_s22, 2 }
  0x4c   : > { %p60_p12 = scmp.ne.s32.totalorder %s1429_s8, %s1425_s7  ;;  %p66_p0 = scmp.ne.s32.totalorder %s1425_s7, %s1421_s30 }
  0x4d   : > { %p67_p8 = scmp.eq.s32.totalorder %s1696_s6, 0  ;;  %s2105_s9 = sld [smem:[#allocation18_spill]] }
  0x4e   : > { %s2195_s22 = smov (%p46_p10, %s2193_s22), 0  ;;  %p2108_p9 = scmp.eq.s32.totalorder %s1457_s15, 0 }
  0x4f   : > { %2106 = sst [smem:[#allocation29_spill]] %s2195_s22  ;;  %s2107_s10 = smov %s2195_s22 }
  0x50   : > { %p1715_p11 = por %p2108_p9, %p60_p12  ;;  %p1721_p3 = por %p67_p8, %p66_p0 }
  0x51   : > { %s48_s18 = ssub.s32 %s1453_s14, %s2107_s10  ;;  %p2111_p13 = scmp.ne.s32.totalorder %s1413_s28, %s1409_s27 }
  0x52   : > { %s2110_s11 = scalar_select %p1721_p3, 1, 0 }
  0x53   : > { %p1732_p2 = por %p2111_p13, %p67_p8  ;;  %s50_s19 = sor.u32 %s49_s21, %s48_s18 }
  0x54   : > { %p169_p4 = scmp.eq.s32.totalorder %s1449_s13, 1  ;;  %s2113_s22 = sld [smem:[#allocation17_spill]] }
  0x55   : > { %s2112_s30 = scalar_select %p1732_p2, 1, 0 }
  0x56   : > { %p51_p6 = scmp.eq.s32.totalorder %s50_s19, 0  ;;  %s2114_s4 = sld [smem:[#allocation16_spill]] }
  0x57   : > { %p171_p1 = scmp.eq.s32.totalorder %s1627_s20, 1  ;;  %s2116_s1 = sld [smem:[#allocation15_spill]] }
  0x58   : > { %s1739_s3 = scalar_select %p169_p4, %s1445_s12, 0 }
  0x59   : > { %s1742_s24 = scalar_select %p51_p6, %s1429_s8, %s53_s23  }
  0x5a   : > { %s172_s27 = scalar_select %p171_p1, %s2189_s16, 0 }
  0x5b   : > { %2115 = sst [smem:[#allocation30_spill]] %s1742_s24  ;;  %s176_s10 = sadd.s32 1, %s1405_s26 }
  0x5c   : > { %p183_p5 = scmp.ne.s32.totalorder %s1405_s26, %s1401_s25  ;;  %s173_s21 = ssub.s32 %s1739_s3, %s172_s27 }
  0x5d   : > { %p189_p10 = scmp.ne.s32.totalorder %s1401_s25, %s2105_s9  ;;  %p174_p12 = scmp.eq.s32.totalorder %s173_s21, 0 }
  0x5e   : > { %p2117_p0 = pmov %p2108_p9  ;;  %s205_s20 = sor.u32 %s173_s21, %s48_s18 }
  0x5f   : > { %p1759_p13 = por %p189_p10, %p67_p8  ;;  %p206_p4 = scmp.eq.s32.totalorder %s205_s20, 0 }
  0x60   : > { %p1753_p9 = por %p183_p5, %p2117_p0  ;;  %s208_s13 = sadd.s32 1, %s2113_s22 }
  0x61   : > { %s2119_s23 = scalar_select %p1759_p13, 1, 0 }
  0x62   : > { %s1764_s16 = scalar_select %p174_p12, %s1405_s26, %s176_s10  }
  0x63   : > { %p218_p6 = scmp.ne.s32.totalorder %s2113_s22, %s2114_s4  ;;  %p219_p1 = scmp.eq.s32.totalorder %s1696_s6, 7 }
  0x64   : > { %2120 = sst [smem:[#allocation31_spill]] %s1764_s16  ;;  %s2197_s22 = smov (!%p206_p4, %s2113_s22), %s208_s13 }
  0x65   : > { %p1773_p5 = por %p219_p1, %p218_p6  ;;  %p224_p8 = scmp.ne.s32.totalorder %s2114_s4, %s2116_s1 }
  0x66   : > { %s2122_s27 = sadd.s32 4294967294, %s1457_s15   ;;  %s254_s18 = sand.u32 1, %s1429_s8  }
  0x67   : > { %s2121_s9 = scalar_select %p1773_p5, 1, 0 }
  0x68   : > { %p225_p10 = scmp.eq.s32.totalorder %s2122_s27, 7  ;;  %s859_s21 = sshll.u32 %s254_s18, 3 }
  0x69   : > { %s860_s20 = sshll.u32 %s1453_s14, 1  ;;  %s258_s24 = scalar_lea.vmem [#allocation4], %s859_s21 }
  0x6a   : > { %p1782_p12 = por %p225_p10, %p224_p8  ;;  %s267_s2 = sshll.u32 %s258_s24, 4  ;;  %s1788_s2 = int_to_ptr.vmem [resolvable:$true] %s267_s2 }
  0x6b   : > { %s263_s29 = sadd.s32 %s1445_s12, %s860_s20  ;;  %p2124_p0 = scmp.lt.s32.totalorder %s1457_s15, 8 }
  0x6c   : > { %s2123_s10 = scalar_select %p1782_p12, 1, 0 }
  0x6d   : > { %s861_s13 = sshll.u32 %s263_s29, 7  ;;  %p1794_p4 = pnand %p2124_p0, %p1715_p11 }
  0x6e   : > { %s2126_s27 = sld [smem:[#allocation32_spill]]  ;;  %s299_s24 = sand.u32 1, %s1405_s26  }
  0x6f   : > { %s1804_s21 = sshll.u32 %s299_s24, 6  ;;  %s255_s29 = scalar_lea.sflag [#allocation5], %s254_s18 }
  0x70   : > { %p1205_p6 = pneg %p1794_p4 }
  0x74   : > { %s2127_s6 = smov %s2126_s27  ;;  %s1801_s8 = scalar_lea.hbm %s2126_s27, %s861_s13 }
  0x75   : > { %s1203_s17 = scalar_lea.hbm %s1801_s8, 128  ;;  %s1208_s13 = scalar_lea.hbm %s2127_s6, 512 }
  0x76   : > { %p1204_p11 = scmp.ne.s32.totalorder %s1801_s8, %s1203_s17  ;;  %p1209_p10 = scmp.lt.u32.totalorder %s1801_s8, %s2127_s6 }
  0x77   : > { %p1210_p0 = scmp.lt.u32.totalorder %s1208_s13, %s1203_s17  ;;  %p1212_p5 = scmp.lt.u32.totalorder %s1203_s17, %s1801_s8 }
  0x78   : > { %p1206_p1 = pnand %p1205_p6, %p1204_p11 }
  0x79   : > { %p1211_p12 = por %p1210_p0, %p1209_p10 }
  0x7a   : > { %p1207_p8 = pneg %p1206_p1 }
  0x7b   : > { %p1213_p13 = por %p1212_p5, %p1211_p12 }
  0x7d   : > { %p1214_p2 = pnand %p1213_p13, %p1207_p8 }
  0x7f   : > { %1217 = shalt.err (!%p1214_p2)
}
  0x80   : > { %s1218_s18 = scalar_lea.vmem %s1788_s2, 128  ;;  %s1462_s24 = smov [#allocation4]  }
  0x81   : > { %p1219_p11 = scmp.ne.s32.totalorder %s1788_s2, %s1218_s18  ;;  %s1223_s20 = sshll.u32 %s1462_s24, 4  ;;  %s1224_s20 = int_to_ptr.vmem [resolvable:$false] %s1223_s20 }
  0x82   : > { %s1225_s1 = scalar_lea.vmem %s1224_s20, 256  ;;  %p1226_p7 = scmp.lt.s32.totalorder %s1788_s2, %s1224_s20 }
  0x83   : > { %p1221_p1 = pnand %p1219_p11, %p1205_p6  ;;  %p1227_p10 = scmp.lt.s32.totalorder %s1225_s1, %s1218_s18 }
  0x85   : > { %p1222_p3 = pneg %p1221_p1  ;;  %p1228_p0 = por %p1227_p10, %p1226_p7 }
  0x87   : > { %p1229_p5 = pnand %p1228_p0, %p1222_p3 }
  0x89   : > { %1232 = shalt.err (!%p1229_p5)
}
  0x8a   : > { %974 = dma.hbm_to_vmem [thread:$0]  (!%p1794_p4), %s1801_s8, 128, %s1788_s2, %s255_s29  }
  0x8b   : > { %s866_s17 = sshll.u32 %s1739_s3, 6  ;;  %s2128_s27 = sld [smem:[#allocation37_spill]] }
  0x8c   : > { %s301_s18 = scalar_lea.vmem [#allocation9], %s1804_s21  ;;  %p2130_p7 = scmp.lt.s32.totalorder %s1457_s15, 8 }
  0x8d   : > { %s309_s20 = sshll.u32 %s301_s18, 4  ;;  %s1838_s20 = int_to_ptr.vmem [resolvable:$true] %s309_s20 }
  0x8e   : > { %p1844_p3 = pnand %p2130_p7, %p1753_p9 }
  0x90   : > { %p1235_p13 = pneg %p1844_p3 }
  0x91   : > { %s2129_s6 = smov %s2128_s27  ;;  %s1835_s24 = scalar_lea.hbm %s2128_s27, %s866_s17 }
  0x92   : > { %s1233_s8 = scalar_lea.hbm %s1835_s24, 1024  ;;  %s1238_s21 = scalar_lea.hbm %s2129_s6, 2048 }
  0x93   : > { %p1234_p2 = scmp.ne.s32.totalorder %s1835_s24, %s1233_s8  ;;  %p1239_p9 = scmp.lt.u32.totalorder %s1835_s24, %s2129_s6 }
  0x94   : > { %p1240_p6 = scmp.lt.u32.totalorder %s1238_s21, %s1233_s8  ;;  %p1242_p11 = scmp.lt.u32.totalorder %s1233_s8, %s1835_s24 }
  0x95   : > { %p1236_p12 = pnand %p1235_p13, %p1234_p2 }
  0x96   : > { %p1241_p8 = por %p1240_p6, %p1239_p9 }
  0x97   : > { %p1237_p4 = pneg %p1236_p12 }
  0x98   : > { %p1243_p1 = por %p1242_p11, %p1241_p8 }
  0x9a   : > { %p1244_p10 = pnand %p1243_p1, %p1237_p4 }
  0x9c   : > { %1247 = shalt.err (!%p1244_p10)
}
  0x9d   : > { %s1248_s1 = scalar_lea.vmem %s1838_s20, 1024  ;;  %s1463_s17 = smov [#allocation9]  }
  0x9e   : > { %p1249_p0 = scmp.ne.s32.totalorder %s1838_s20, %s1248_s1  ;;  %s1253_s13 = sshll.u32 %s1463_s17, 4  ;;  %s1254_s13 = int_to_ptr.vmem [resolvable:$false] %s1253_s13 }
  0x9f   : > { %s1255_s4 = scalar_lea.vmem %s1254_s13, 2048  ;;  %p1256_p2 = scmp.lt.s32.totalorder %s1838_s20, %s1254_s13 }
  0xa0   : > { %p1251_p5 = pnand %p1249_p0, %p1235_p13  ;;  %p1257_p12 = scmp.lt.s32.totalorder %s1255_s4, %s1248_s1 }
  0xa2   : > { %p1252_p7 = pneg %p1251_p5  ;;  %p1258_p9 = por %p1257_p12, %p1256_p2 }
  0xa4   : > { %p1259_p6 = pnand %p1258_p9, %p1252_p7 }
  0xa6   : > { %1262 = shalt.err (!%p1259_p6)
}
  0xa7   : > { %s1464_s27 = smov 128   ;;  %s2132_s18 = smov 4  }
  0xa8   : > { %s2133_s8 = smov 64   ;;  %p2134_p13 = scmp.ne.s32.totalorder %s2103_s5, 0 }
  0xa9   : > { %980 = dma.hbm_to_vmem [thread:$0]  (!%p1844_p3), %s1835_s24, 1024, %s1838_s20, %s1658_s0, %s1464_s27, %s2133_s8, %s2132_s18  }
  0xaa   : > { %321 = sbr.rel (%p2134_p13) target bundleno = 989 (0x3dd), region = 44  ;;  %s323_s2 = sand.u32 (!%p2134_p13), 1, %s1425_s7  }
  0xab   : > { %s1879_s3 = sshll.u32 (!%p2134_p13), %s323_s2, 3  ;;  %s324_s21 = scalar_lea.sflag (!%p2134_p13), [#allocation5], %s323_s2 }
  0xac   : > { %s327_s19 = scalar_lea.vmem (!%p2134_p13), [#allocation4], %s1879_s3  ;;  %p2135_p4 = scmp.ne.s32.totalorder (!%p2134_p13), %s2110_s11, 0 }
  0xb1   : > { %1368 = dma.done.wait (%p2135_p4), %s324_s21, 128  }
  0xb2   : > { %1370 = vsyncadd (%p2135_p4), %s324_s21, 4294967168  ;;  %s2136_s16 = sld [smem:[#allocation28_spill]]  ;;  %s334_s24 = sand.u32 1, %s1413_s28  }
  0xb3   : > { %s869_s5 = sshll.u32 %s334_s24, 6  ;;  %p2137_p3 = scmp.ne.s32.totalorder %s2112_s30, 0 }
  0xb4   : > { %s1888_s29 = scalar_lea.vmem [#allocation7], %s869_s5 }
  0xb8   : > { %s332_s0 = sand.u32 1, %s2136_s16  }
  0xb9   : > { %s333_s20 = scalar_lea.sflag [#allocation8], %s332_s0 }
  0xba   : > { %1372 = dma.done.wait (%p2137_p3), %s333_s20, 1024  }
  0xbb   : > { %1374 = vsyncadd (%p2137_p3), %s333_s20, 4294966272  ;;  %s343_s1 = sand.u32 1, %s1401_s25   ;;  %p2138_p8 = scmp.ne.s32.totalorder %s2119_s23, 0 }
  0xbc   : > { %s870_s17 = sshll.u32 %s343_s1, 6 }
  0xbd   : > { %s1895_s11 = scalar_lea.vmem [#allocation9], %s870_s17 }
  0xbe   : > { %1376 = dma.done.wait (%p2138_p8), %s333_s20, 1024  }
  0xbf   : > { %1378 = vsyncadd (%p2138_p8), %s333_s20, 4294966272  ;;  %s2139_s13 = sld [smem:[#allocation16_spill]]  ;;  %s2140_s4 = sld [smem:[#allocation22_spill]] }
  0xc0   : > { %s2141_s27 = sld [smem:[#allocation21_spill]] }
  0xc5   : > { %s381_s18 = sand.u32 1, %s2139_s13   ;;  %p392_p11 = scmp.eq.s32.totalorder %s2140_s4, 0 }
  0xc6   : > { %s871_s30 = sshll.u32 %s381_s18, 4  ;;  %p393_p1 = scmp.eq.s32.totalorder %s2141_s27, 0 }
  0xc7   : > { %s1908_s8 = scalar_lea.vmem [#allocation10], %s871_s30 }
  0xc8   : > { %p394_p10 = pnand %p393_p1, %p392_p11 }
  0xc9   : > { %v1465_v0 = vmov (!%p394_p10), 0.0  }
  0xca   : > { %397 = sbr.rel (%p394_p10) target bundleno = 209 (0xd1), region = 60  ;;  %398 = vst [vmem:[#allocation2] sm:$0xff] (!%p394_p10), %v1465_v0 }
  0xd1 PF: > { %s2142_s23 = sld [smem:[#allocation22_spill]] }
  0xd7   : > { %p872_p0 = scmp.ne.s32.totalorder %s2142_s23, 0 }
  0xd8   : > { %v1154_v1 = vld [vmem:[%s1888_s29] sm:$0xff] (!%p872_p0)   ;;  %v1466_v2 = vmov (!%p872_p0), 0.0   ;;  %v1155_v3 = vld [vmem:[%s1888_s29 + $0x8] sm:$0xff] (!%p872_p0)   ;;  %vm1467_vm0 = vmmov (!%p872_p0), 0   ;;  %v1156_v4 = vld [vmem:[%s1888_s29 + $0x10] sm:$0xff] (!%p872_p0)  }
  0xd9   : > { %401 = sbr.rel (%p872_p0) target bundleno = 464 (0x1d0), region = 64  ;;  %917 = vmatprep.subr.bf16.mxu0 (!%p872_p0), %v1466_v2  ;;  %933 = vmatprep.mubr.msk.bf16.mxu0 (!%p872_p0), %vm1467_vm0, %v1466_v2  ;;  %v1157_v5 = vld [vmem:[%s1888_s29 + $0x18] sm:$0xff] (!%p872_p0)   ;;  %v1158_v6 = vld [vmem:[%s1888_s29 + $0x20] sm:$0xff] (!%p872_p0)   ;;  %v1159_v7 = vld [vmem:[%s1888_s29 + $0x28] sm:$0xff] (!%p872_p0)  }
  0xda   : > { %918 = vmatpush3.bf16.msra.mxu0 (!%p872_p0), %v1154_v1  ;;  %v1160_v8 = vld [vmem:[%s1888_s29 + $0x30] sm:$0xff] (!%p872_p0)   ;;  %v1161_v9 = vld [vmem:[%s1888_s29 + $0x38] sm:$0xff] (!%p872_p0)   ;;  %v402_v12 = vld [vmem:[#allocation2] sm:$0xff] (!%p872_p0) }
  0xdb   : > { %919 = vmatprep.subr.bf16.mxu0 (!%p872_p0), %v1466_v2  ;;  %v403_v10 = vld [vmem:[%s327_s19] sm:$0xff] (!%p872_p0) }
  0xdc   : > { %v404_v11 = vpack.c.bf16 (!%p872_p0), %v403_v10, %v403_v10 }
  0xde   : > { %920 = vmatpush3.bf16.msra.mxu0 (!%p872_p0), %v1155_v3 }
  0xdf   : > { %921 = vmatprep.subr.bf16.mxu0 (!%p872_p0), %v1466_v2 }
  0xe2   : > { %922 = vmatpush3.bf16.msra.mxu0 %v1156_v4 }
  0xe3   : > { %923 = vmatprep.subr.bf16.mxu0 %v1466_v2 }
  0xe6   : > { %924 = vmatpush3.bf16.msra.mxu0 %v1157_v5 }
  0xe7   : > { %925 = vmatprep.subr.bf16.mxu0 %v1466_v2 }
  0xea   : > { %926 = vmatpush3.bf16.msra.mxu0 %v1158_v6 }
  0xeb   : > { %927 = vmatprep.subr.bf16.mxu0 %v1466_v2 }
  0xee   : > { %928 = vmatpush3.bf16.msra.mxu0 %v1159_v7 }
  0xef   : > { %929 = vmatprep.subr.bf16.mxu0 %v1466_v2 }
  0xf2   : > { %930 = vmatpush3.bf16.msra.mxu0 %v1160_v8 }
  0xf3   : > { %931 = vmatprep.subr.bf16.mxu0 %v1466_v2 }
  0xf6   : > { %932 = vmatpush3.bf16.msra.mxu0 %v1161_v9 }
  0xf9   : > { %934 = vmatmul.mubr.bf16.vlgmr.msra.gmra.mrb[0].mxu0 %v404_v11 }
 0x1cc   : > { %v503_v13 = vpop.f32.mrb[0].mxu0 }
 0x1cd   : > { %v509_v14 = vadd.f32 %v503_v13, %v402_v12  ;;  %v935_v15 = vpop.f32.mrb[1].mxu0 }
 0x1ce   : > { %v506_v16 = vpop.f32.mrb[2].mxu0 }
 0x1cf   : > { %510 = vst [vmem:[#allocation2] sm:$0xff] %v509_v14  ;;  %v936_v17 = vpop.f32.mrb[3].mxu0 }
 0x1d0 PF: > { %s2143_s2 = sld [smem:[#allocation21_spill]] }
 0x1d6   : > { %p511_p5 = scmp.eq.s32.totalorder %s2143_s2, 1 }
 0x1d8   : > { %p512_p7 = pnand %p511_p5, %p392_p11 }
 0x1d9   : > { %v517_v18 = vld [vmem:[#allocation2] sm:$0xff] (!%p512_p7)  ;;  %vm529_vm1 = vcmask (!%p512_p7), 1043456   ;;  %v1468_v19 = vmov (!%p512_p7), 0.0   ;;  %vm1469_vm2 = vmmov (!%p512_p7), 0   ;;  %s2145_s24 = sld [smem:[#allocation35_spill]] (!%p512_p7)  ;;  %s2146_s29 = sld [smem:[#allocation36_spill]] (!%p512_p7)  ;;  %v574_v28 = vlaneseq (!%p512_p7) }
 0x1da   : > { %515 = sbr.rel (%p512_p7) target bundleno = 702 (0x2be), region = 68  ;;  %937 = vmatprep.subr.bf16.mxu0 (!%p512_p7), %v1468_v19  ;;  %v518_v20 = vpack.c.bf16 (!%p512_p7), %v517_v18, %v517_v18  ;;  %939 = vmatprep.mubr.msk.bf16.mxu0 (!%p512_p7), %vm1469_vm2, %v1468_v19  ;;  %v1470_v23 = vmov (!%p512_p7), 0   ;;  %v1471_v24 = vmov (!%p512_p7), 1   ;;  %s2147_s13 = sld [smem:[#allocation34_spill]] (!%p512_p7)  ;;  %vm525_vm3 = vcmask (!%p512_p7), 64512  }
 0x1db   : > { %1162 = vset.pattern.permute.xlu0 (!%p512_p7), %v1470_v23  ;;  %1163 = vset.pattern.permute.xlu1 (!%p512_p7), %v1471_v24  ;;  %v575_v29 = vand.u32 (!%p512_p7), 127, %v574_v28 }
 0x1dc   : > { %v531_v25 = vsel (!%p512_p7), %vm529_vm1, %v518_v20, 0 }
 0x1dd   : > { %938 = vmatpush3.bf16.msra.mxu0 (!%p512_p7), %v531_v25 }
 0x1df   : > { %v519_v21 = vld [vmem:[%s2145_s24] sm:$0xff] (!%p512_p7) }
 0x1e0   : > { %v576_v22 = vld [vmem:[%s2146_s29] sm:$0xff] (!%p512_p7)  ;;  %522 = vperm.xlu0 (!%p512_p7), %1162, %v519_v21  }
 0x1e1   : > { %582 = vperm.xlu1 %1163, %v576_v22   ;;  %v516_v26 = vld [vmem:[%s2147_s13] sm:$0xf] }
 0x1e2   : > { %940 = vmatmul.mubr.msk.bf16.vlgmr.msra.gmra.mrb[0].mxu0 %vm525_vm3, %v516_v26 }
 0x1e4   : > { %578 = vperm.xlu0 %1162, %v576_v22  }
 0x1e8   : > { %1164 = vset.pattern.permute.xlu0 %v1471_v24 }
 0x25f   : > { %v523_v27 = vpop.permute.xlu0 %522 }
 0x260   : > { %v583_v30 = vpop.permute.xlu1 %582 }
 0x261   : > { %vm584_vm4 = vcmp.lt.s32.totalorder %v575_v29, %v583_v30 }
 0x263   : > { %v579_v31 = vpop.permute.xlu0 %578 }
 0x264   : > { %vm580_vm5 = vcmp.ge.s32.totalorder %v575_v29, %v579_v31 }
 0x265   : > { %vm585_vm6 = vmand %vm580_vm5, %vm584_vm4 }
 0x2b5   : > { %v567_v32 = vpop.f32.mrb[0].mxu0 }
 0x2b6   : > { %v568_v33 = vadd.f32 %v567_v32, %v523_v27  ;;  %v941_v34 = vpop.f32.mrb[1].mxu0 }
 0x2b7   : > { %v570_v35 = vpop.f32.mrb[2].mxu0 }
 0x2b8   : > { %v573_v36 = vmax.f32 %v568_v33, 0.0  ;;  %v942_v37 = vpop.f32.mrb[3].mxu0 }
 0x2ba   : > { %v586_v38 = vsel %vm585_vm6, %v573_v36, 0.0 }
 0x2bb   : > { %v587_v39 = vpack.c.bf16 %v586_v38, %v586_v38 }
 0x2bd   : > { %588 = vst [vmem:[#allocation3] sm:$0xf] %v587_v39 }
 0x2be PF: > { %s2148_s4 = sld [smem:[#allocation22_spill]] }
 0x2c4   : > { %p882_p2 = scmp.ne.s32.totalorder %s2148_s4, 1 }
 0x2c5   : > { %v593_v40 = vld [vmem:[%s327_s19] sm:$0xff] (!%p882_p2)  ;;  %v1472_v41 = vmov (!%p882_p2), 0.0   ;;  %v1165_v42 = vld [vmem:[%s1895_s11] sm:$0xff] (!%p882_p2)   ;;  %vm1473_vm7 = vmmov (!%p882_p2), 0   ;;  %v1166_v43 = vld [vmem:[%s1895_s11 + $0x8] sm:$0xff] (!%p882_p2)  }
 0x2c6   : > { %592 = sbr.rel (%p882_p2) target bundleno = 957 (0x3bd), region = 72  ;;  %594 = vst [vmem:[%s1908_s8] sm:$0xff] (!%p882_p2), %v593_v40  ;;  %943 = vmatprep.subr.bf16.mxu0 (!%p882_p2), %v1472_v41  ;;  %959 = vmatprep.mubr.msk.bf16.mxu0 (!%p882_p2), %vm1473_vm7, %v1472_v41  ;;  %v1167_v44 = vld [vmem:[%s1895_s11 + $0x10] sm:$0xff] (!%p882_p2)   ;;  %v1168_v45 = vld [vmem:[%s1895_s11 + $0x18] sm:$0xff] (!%p882_p2)   ;;  %v1169_v46 = vld [vmem:[%s1895_s11 + $0x20] sm:$0xff] (!%p882_p2)  }
 0x2c7   : > { %944 = vmatpush3.bf16.msra.mxu0 (!%p882_p2), %v1165_v42  ;;  %v1170_v47 = vld [vmem:[%s1895_s11 + $0x28] sm:$0xff] (!%p882_p2)   ;;  %v1171_v48 = vld [vmem:[%s1895_s11 + $0x30] sm:$0xff] (!%p882_p2)   ;;  %v1172_v49 = vld [vmem:[%s1895_s11 + $0x38] sm:$0xff] (!%p882_p2)  }
 0x2c8   : > { %945 = vmatprep.subr.bf16.mxu0 (!%p882_p2), %v1472_v41  ;;  %v595_v50 = vld [vmem:[#allocation3] sm:$0xf] (!%p882_p2) }
 0x2cb   : > { %946 = vmatpush3.bf16.msra.mxu0 (!%p882_p2), %v1166_v43 }
 0x2cc   : > { %947 = vmatprep.subr.bf16.mxu0 (!%p882_p2), %v1472_v41 }
 0x2cf   : > { %948 = vmatpush3.bf16.msra.mxu0 %v1167_v44 }
 0x2d0   : > { %949 = vmatprep.subr.bf16.mxu0 %v1472_v41 }
 0x2d3   : > { %950 = vmatpush3.bf16.msra.mxu0 %v1168_v45 }
 0x2d4   : > { %951 = vmatprep.subr.bf16.mxu0 %v1472_v41 }
 0x2d7   : > { %952 = vmatpush3.bf16.msra.mxu0 %v1169_v46 }
 0x2d8   : > { %953 = vmatprep.subr.bf16.mxu0 %v1472_v41 }
 0x2db   : > { %954 = vmatpush3.bf16.msra.mxu0 %v1170_v47 }
 0x2dc   : > { %955 = vmatprep.subr.bf16.mxu0 %v1472_v41 }
 0x2df   : > { %956 = vmatpush3.bf16.msra.mxu0 %v1171_v48 }
 0x2e0   : > { %957 = vmatprep.subr.bf16.mxu0 %v1472_v41 }
 0x2e3   : > { %958 = vmatpush3.bf16.msra.mxu0 %v1172_v49 }
 0x2e6   : > { %960 = vmatmul.mubr.bf16.vlgmr.msra.gmra.mrb[0].mxu0 %v595_v50 }
 0x3b9   : > { %v694_v51 = vpop.f32.mrb[0].mxu0 }
 0x3ba   : > { %700 = vst [vmem:[%s1908_s8 + $0x8] sm:$0xff] %v694_v51  ;;  %v961_v52 = vpop.f32.mrb[1].mxu0 }
 0x3bb   : > { %v697_v53 = vpop.f32.mrb[2].mxu0 }
 0x3bc   : > { %v962_v54 = vpop.f32.mrb[3].mxu0 }
 0x3bd PF: > { %s2149_s3 = sld [smem:[#allocation22_spill]]  ;;  %s2150_s19 = sld [smem:[#allocation23_spill]] }
 0x3be   : > { %s2151_s27 = sld [smem:[#allocation21_spill]]  ;;  %s718_s2 = sshll.u32 %s1908_s8, 4  ;;  %s1950_s2 = int_to_ptr.vmem [resolvable:$true] %s718_s2 }
 0x3bf   : > { %s2153_s24 = sld [smem:[#allocation38_spill]]  ;;  %s1959_s29 = scalar_lea.sflag [#allocation6], %s381_s18 }
 0x3c0   : > { %s1263_s1 = scalar_lea.vmem %s1950_s2, 256  ;;  %p2155_p6 = scmp.ne.s32.totalorder %s2121_s9, 0 }
 0x3c1   : > { %p1264_p9 = scmp.ne.s32.totalorder %s1950_s2, %s1263_s1  ;;  %s1474_s8 = smov [#allocation10]  }
 0x3c2   : > { %s1267_s17 = sshll.u32 %s1474_s8, 4  ;;  %s1268_s17 = int_to_ptr.vmem [resolvable:$false] %s1267_s17 }
 0x3c3   : > { %p709_p12 = scmp.eq.s32.totalorder %s2149_s3, 1  ;;  %s892_s23 = sshll.u32 %s2150_s19, 2 }
 0x3c4   : > { %p1265_p13 = pnand %p1264_p9, %p2155_p6  ;;  %s1269_s13 = scalar_lea.vmem %s1268_s17, 512 }
 0x3c5   : > { %s2199_s27 = smov (!%p709_p12, %s2151_s27), 0  ;;  %s2154_s5 = smov %s2153_s24 }
 0x3c6   : > { %s715_s11 = sadd.s32 %s892_s23, %s2199_s27  ;;  %p1266_p4 = pneg %p1265_p13 }
 0x3c7   : > { %s893_s21 = sshll.u32 %s715_s11, 7  ;;  %p1270_p3 = scmp.lt.s32.totalorder %s1950_s2, %s1268_s17 }
 0x3c8   : > { %s1955_s20 = scalar_lea.hbm %s2153_s24, %s893_s21  ;;  %p1271_p8 = scmp.lt.s32.totalorder %s1269_s13, %s1263_s1 }
 0x3ca   : > { %p1272_p11 = por %p1271_p8, %p1270_p3 }
 0x3cc   : > { %p1273_p1 = pnand %p1272_p11, %p1266_p4 }
 0x3ce   : > { %1276 = shalt.err (!%p1273_p1)
}
 0x3cf   : > { %s1277_s18 = scalar_lea.hbm %s1955_s20, 256  ;;  %s1281_s19 = scalar_lea.hbm %s2154_s5, 1024 }
 0x3d0   : > { %p1278_p10 = scmp.ne.s32.totalorder %s1955_s20, %s1277_s18  ;;  %p1282_p7 = scmp.lt.u32.totalorder %s1955_s20, %s2154_s5 }
 0x3d1   : > { %p1283_p2 = scmp.lt.u32.totalorder %s1281_s19, %s1277_s18  ;;  %p1285_p9 = scmp.lt.u32.totalorder %s1277_s18, %s1955_s20 }
 0x3d2   : > { %p1279_p0 = pnand %p1278_p10, %p2155_p6 }
 0x3d3   : > { %p1284_p12 = por %p1283_p2, %p1282_p7 }
 0x3d4   : > { %p1280_p5 = pneg %p1279_p0 }
 0x3d5   : > { %p1286_p13 = por %p1285_p9, %p1284_p12 }
 0x3d7   : > { %p1287_p4 = pnand %p1286_p13, %p1280_p5 }
 0x3d9   : > { %1290 = shalt.err (!%p1287_p4)
}
 0x3da   : > { %s1475_s23 = smov 128   ;;  %s1476_s11 = smov 256  }
 0x3db   : > { %s1477_s21 = smov 8  }
 0x3dc   : > { %969 = dma.vmem_to_hbm [thread:$0]  (%p2155_p6), %s1950_s2, 256, %s1955_s20, %s1959_s29, %s1475_s23, %s1476_s11, %s1477_s21  }
 0x3dd PF: > { %s2156_s16 = sld [smem:[#allocation15_spill]]  ;;  %p986_p3 = scmp.ge.s32.totalorder %s1457_s15, 2 }
 0x3de   : > { %p2157_p8 = scmp.ne.s32.totalorder %s2123_s10, 0 }
 0x3e0   : > { %p982_p11 = pnand %p986_p3, %p2157_p8 }
 0x3e3   : > { %s733_s0 = sand.u32 1, %s2156_s16  }
 0x3e4   : > { %s734_s24 = scalar_lea.sflag [#allocation6], %s733_s0 }
 0x3e5   : > { %1380 = dma.done.wait (!%p982_p11), %s734_s24, 256  }
 0x3e6   : > { %1382 = vsyncadd (!%p982_p11), %s734_s24, 4294967040  ;;  %s25_s15 = sadd.s32 1, %s1457_s15   ;;  %s2159_s21 = sld [smem:[#allocation16_spill]] }
 0x3e7   : > { %p1988_p1 = scmp.ge.s32.totalorder %s25_s15, 10   ;;  %s2160_s9 = sld [smem:[#allocation17_spill]] }
 0x3e8   : > { %s2161_s2 = smov %s2197_s22  ;;  %s2162_s20 = sld [smem:[#allocation31_spill]] }
 0x3e9   : > { %s2163_s29 = sld [smem:[#allocation19_spill]]  ;;  %s2164_s8 = sld [smem:[#allocation27_spill]] }
 0x3ea   : > { %s2165_s10 = sld [smem:[#allocation20_spill]]  ;;  %s2166_s17 = sld [smem:[#allocation30_spill]] }
 0x3eb   : > { %s2167_s13 = sld [smem:[#allocation24_spill]]  ;;  %s2168_s18 = sld [smem:[#allocation25_spill]] }
 0x3ec   : > { %s2169_s4 = sld [smem:[#allocation26_spill]]  ;;  %s2171_s3 = sld [smem:[#allocation29_spill]] }
 0x3ed   : > { %s2170_s22 = smov %s2160_s9  ;;  %s2172_s23 = smov %s2161_s2 }
 0x3ee   : > { %s2173_s24 = smov %s1401_s25  ;;  %s2174_s25 = smov %s1405_s26 }
 0x3ef   : > { %s2175_s26 = smov %s2162_s20  ;;  %s2176_s27 = smov %s1413_s28 }
 0x3f0   : > { %s2177_s28 = smov %s2163_s29  ;;  %s2178_s29 = smov %s2164_s8 }
 0x3f1   : > { %s2179_s30 = smov %s1425_s7  ;;  %s2180_s7 = smov %s2165_s10 }
 0x3f2   : > { %s2181_s8 = smov %s2166_s17  ;;  %s2182_s9 = smov %s1445_s12 }
 0x3f3   : > { %s2183_s10 = smov %s2167_s13  ;;  %s2184_s11 = smov %s1453_s14 }
 0x3f4   : > { %s2185_s12 = smov %s2168_s18  ;;  %s2186_s13 = smov %s2169_s4 }
 0x3f5   : > { %s2187_s14 = smov %s2171_s3  ;;  %24 = sbr.rel (!%p1988_p1) target bundleno = 23 (0x17), region = 129 }
 0x3fc   :  { %739 = vsyncpa [#allocation5], 1 }
 0x3fd   :  { %741 = vsyncpa [#allocation5 + $0x1], 1 }
 0x3fe   :  { %742 = vsyncpa [#allocation8], 1 }
 0x3ff   :  { %744 = vsyncpa [#allocation8 + $0x1], 1 }
 0x400   :  { %745 = vsyncpa [#allocation6], 1 }
 0x401   :  { %747 = vsyncpa [#allocation6 + $0x1], 1 }

</bundles_post_ra>
